<compile_context>
chip_gen: v7x
topology: tpu7x:2x2x1
jax: 0.10.0
libtpu: 0.0.40
codegen_flags: <defaults>
</compile_context>

<pallas_src>
import math
import functools

import jax
import jax.numpy as jnp
from jax import lax
from jax.experimental import pallas as pl
from jax.experimental.pallas import tpu as pltpu


# ---------------------------------------------------------------------------
# Kernel 1: fused, tiled Q/K/V projection.
#   x  : [B*S, H]
#   w3 : [3, H, H]    stacked & pre-transposed (w3[t] = W_t.T)
#   b3 : [3, 1, H]
#   out: [3, B*S, H]  (t = 0 -> Q, 1 -> K, 2 -> V)
# grid = (3, M blocks, N blocks, K blocks); K axis accumulates into VMEM scratch.
# ---------------------------------------------------------------------------
def _qkv_proj_kernel(x_ref, w_ref, b_ref, o_ref, acc_ref):
    k = pl.program_id(3)

    @pl.when(k == 0)
    def _():
        acc_ref[...] = jnp.zeros_like(acc_ref)

    acc_ref[...] += jnp.dot(x_ref[...], w_ref[...],
                            preferred_element_type=jnp.float32)

    @pl.when(k == pl.num_programs(3) - 1)
    def _():
        o_ref[...] = (acc_ref[...] + b_ref[...]).astype(o_ref.dtype)


def qkv_proj(x, w3, b3, *, tm=256, tn=256, tk=512):
    bs, h = x.shape
    tm = min(tm, bs)
    tn = min(tn, h)
    tk = min(tk, h)
    grid = (3, pl.cdiv(bs, tm), pl.cdiv(h, tn), pl.cdiv(h, tk))
    return pl.pallas_call(
        _qkv_proj_kernel,
        out_shape=jax.ShapeDtypeStruct((3, bs, h), jnp.float32),
        grid=grid,
        in_specs=[
            pl.BlockSpec((tm, tk), lambda t, i, j, k: (i, k)),
            pl.BlockSpec((None, tk, tn), lambda t, i, j, k: (t, k, j)),
            pl.BlockSpec((None, 1, tn), lambda t, i, j, k: (t, 0, j)),
        ],
        out_specs=pl.BlockSpec((None, tm, tn), lambda t, i, j, k: (t, i, j)),
        scratch_shapes=[pltpu.VMEM((tm, tn), jnp.float32)],
        compiler_params=pltpu.CompilerParams(
            dimension_semantics=("parallel", "parallel", "parallel", "arbitrary")),
    )(x, w3, b3)


# ---------------------------------------------------------------------------
# Kernel 2: relational attention.  One (batch, head-group) tile per grid point.
#   q_ref/k_ref/v_ref : [S, HG*Dh]   (head-group column slab, selected by BlockSpec)
#   dep_ref           : [S, S, Dh]   (shared across heads; selected by batch index)
#   mask_ref          : [1, S]       (additive, broadcast over query rows)
#   ctx_ref           : [S, HG*Dh]   (written directly into merged [B,S,H] layout)
#   probs_ref         : [HG, S, S]   (optional)
# ---------------------------------------------------------------------------
def _attn_kernel(q_ref, k_ref, v_ref, dep_ref, mask_ref, ctx_ref, *rest,
                 heads_per_step, head_dim, scale, with_probs):
    probs_ref = rest[0] if with_probs else None

    dep = dep_ref[...]          # [S, S, Dh]  loaded once per head group
    mask = mask_ref[...]        # [1, S]

    for i in range(heads_per_step):
        col = slice(i * head_dim, (i + 1) * head_dim)
        # Fold 1/sqrt(Dh) into q once (S*Dh mults instead of S*S); the same
        # scaled q feeds both the content and the relational score terms, which
        # is equivalent to scaling their sum.
        q = q_ref[:, col] * scale                                         # [S, Dh]
        k = k_ref[:, col]                                                 # [S, Dh]
        v = v_ref[:, col]                                                 # [S, Dh]

        # Content scores Q K^T: contract last dims, no explicit transpose of K.
        scores = lax.dot_general(q, k, (((1,), (1,)), ((), ())),
                                 preferred_element_type=jnp.float32)      # [S, S]

        # Relational scores on the MXU: batched over the query axis,
        # per-query [1, Dh] x [Dh, S] -> [1, S]  (no [S,S,Dh] intermediate).
        q3 = q[:, None, :]                                                # [S, 1, Dh]
        rel = lax.dot_general(q3, dep, (((2,), (2,)), ((0,), (0,))),
                              preferred_element_type=jnp.float32)         # [S, 1, S]
        scores = scores + rel[:, 0, :] + mask                             # mask bcasts rows

        # Softmax over keys; reciprocal rides the EUP instead of a VALU divide.
        m = jnp.max(scores, axis=-1, keepdims=True)
        e = jnp.exp(scores - m)
        denom = jnp.sum(e, axis=-1, keepdims=True)
        probs = e * pl.reciprocal(denom, approx=False)                    # [S, S]
        # TODO(synk): attention-prob dropout omitted (eval-mode identity).

        # Context: probs @ V  plus relational value term, also as a batched
        # MXU contraction: per-query [1, S] x [S, Dh] -> [1, Dh].
        ctx = jnp.dot(probs, v, preferred_element_type=jnp.float32)       # [S, Dh]
        p3 = probs[:, None, :]                                            # [S, 1, S]
        rel_ctx = lax.dot_general(p3, dep, (((2,), (1,)), ((0,), (0,))),
                                  preferred_element_type=jnp.float32)     # [S, 1, Dh]
        ctx_ref[:, col] = (ctx + rel_ctx[:, 0, :]).astype(ctx_ref.dtype)

        if with_probs:
            probs_ref[i, :, :] = probs.astype(probs_ref.dtype)


def _pick_heads_per_step(num_heads, head_dim):
    """Smallest head group whose lane width is a multiple of 128 (unmasked
    stores, wide MXU); otherwise fall back to all heads (full hidden width,
    always a legal block)."""
    for hg in range(1, num_heads + 1):
        if num_heads % hg == 0 and (hg * head_dim) % 128 == 0:
            return hg
    return num_heads


def relational_attention(qkv, dep, mask2d, num_heads, head_dim, *,
                         output_attentions=True, probs_dtype=jnp.float32):
    """qkv: [3, B, S, H]; dep: [B, S, S, Dh]; mask2d: [B, 1, S]."""
    _, B, S, H = qkv.shape
    hg = _pick_heads_per_step(num_heads, head_dim)
    ng = num_heads // hg
    hw = hg * head_dim                      # lane width handled per grid step

    kernel = functools.partial(
        _attn_kernel, heads_per_step=hg, head_dim=head_dim,
        scale=1.0 / math.sqrt(head_dim), with_probs=output_attentions)

    def qkv_spec(t):
        # Same [3,B,S,H] array passed three times; the BlockSpec picks Q/K/V and
        # the head-group columns, so the wrapper never slices or transposes.
        return pl.BlockSpec((None, None, S, hw), lambda b, g, t=t: (t, b, 0, g))

    in_specs = [
        qkv_spec(0), qkv_spec(1), qkv_spec(2),
        pl.BlockSpec((None, S, S, head_dim), lambda b, g: (b, 0, 0, 0)),
        pl.BlockSpec((None, 1, S), lambda b, g: (b, 0, 0)),
    ]
    ctx_spec = pl.BlockSpec((None, S, hw), lambda b, g: (b, 0, g))
    ctx_shape = jax.ShapeDtypeStruct((B, S, H), jnp.float32)
    if output_attentions:
        out_shape = (ctx_shape,
                     jax.ShapeDtypeStruct((B, num_heads, S, S), probs_dtype))
        out_specs = (ctx_spec,
                     pl.BlockSpec((None, hg, S, S), lambda b, g: (b, g, 0, 0)))
    else:
        out_shape = ctx_shape
        out_specs = ctx_spec

    return pl.pallas_call(
        kernel,
        out_shape=out_shape,
        grid=(B, ng),
        in_specs=in_specs,
        out_specs=out_specs,
        compiler_params=pltpu.CompilerParams(
            dimension_semantics=("parallel", "parallel"),
            vmem_limit_bytes=64 * 1024 * 1024),
    )(qkv, qkv, qkv, dep, mask2d)


# ---------------------------------------------------------------------------
# Module wrapper
# ---------------------------------------------------------------------------
def prepare_qkv_params(params):
    """Done ONCE at module init: stack & transpose the three nn.Linear weights."""
    w3 = jnp.stack([params["wq"].T, params["wk"].T, params["wv"].T], axis=0)   # [3,H,H]
    b3 = jnp.stack([params["bq"], params["bk"], params["bv"]], axis=0)[:, None, :]
    return {"w3": w3.astype(jnp.float32), "b3": b3.astype(jnp.float32)}


def relational_bert_self_attention(hidden_states, attention_mask, dep_rel_matrix,
                                   qkv_params, num_heads, *,
                                   output_attentions=True,
                                   probs_dtype=jnp.float32):
    B, S, H = hidden_states.shape
    head_dim = H // num_heads

    x2d = hidden_states.reshape(B * S, H)
    qkv = qkv_proj(x2d, qkv_params["w3"], qkv_params["b3"])     # [3, B*S, H]
    qkv = qkv.reshape(3, B, S, H)                               # free reshape, no transposes

    mask2d = attention_mask.reshape(B, 1, S)                    # [B, 1, S]

    result = relational_attention(qkv, dep_rel_matrix, mask2d, num_heads, head_dim,
                                  output_attentions=output_attentions,
                                  probs_dtype=probs_dtype)
    if output_attentions:
        ctx, probs = result
        return ctx, probs
    return (result,)


# ---------------------------------------------------------------------------
# Pure-JAX reference (mirrors the PyTorch forward)
# ---------------------------------------------------------------------------
def reference(hidden, mask, dep, params, num_heads):
    B, S, H = hidden.shape
    d = H // num_heads
    q = hidden @ params["wq"].T + params["bq"]
    k = hidden @ params["wk"].T + params["bk"]
    v = hidden @ params["wv"].T + params["bv"]

    def split(x):
        return x.reshape(B, S, num_heads, d).transpose(0, 2, 1, 3)

    q, k, v = split(q), split(k), split(v)
    scores = jnp.einsum("bhqd,bhkd->bhqk", q, k)
    rel = jnp.einsum("bhqd,bqkd->bhqk", q, dep)
    scores = (scores + rel) / math.sqrt(d) + mask
    probs = jax.nn.softmax(scores, axis=-1)
    ctx = jnp.einsum("bhqk,bhkd->bhqd", probs, v)
    ctx = ctx + jnp.einsum("bhqk,bqkd->bhqd", probs, dep)
    ctx = ctx.transpose(0, 2, 1, 3).reshape(B, S, H)
    return ctx, probs


if __name__ == "__main__":
    B, S, H, NH = 2, 8, 32, 4
    D = H // NH

    key = jax.random.PRNGKey(0)
    ks = jax.random.split(key, 10)

    hidden = jax.random.normal(ks[0], (B, S, H), dtype=jnp.float32)
    dep_rel = 0.1 * jax.random.normal(ks[1], (B, S, S, D), dtype=jnp.float32)

    # additive attention mask [B, 1, 1, S]: mask out last two key positions of batch 1
    mask = jnp.zeros((B, 1, 1, S), dtype=jnp.float32)
    mask = mask.at[1, 0, 0, -2:].set(-10000.0)

    # Deterministic parameter init (nn.Linear(H, H): weight [out, in], bias [out]).
    scale = 1.0 / math.sqrt(H)
    params = {
        "wq": scale * jax.random.normal(ks[2], (H, H), dtype=jnp.float32),
        "bq": scale * jax.random.normal(ks[3], (H,), dtype=jnp.float32),
        "wk": scale * jax.random.normal(ks[4], (H, H), dtype=jnp.float32),
        "bk": scale * jax.random.normal(ks[5], (H,), dtype=jnp.float32),
        "wv": scale * jax.random.normal(ks[6], (H, H), dtype=jnp.float32),
        "bv": scale * jax.random.normal(ks[7], (H,), dtype=jnp.float32),
    }
    qkv_params = prepare_qkv_params(params)     # hoisted out of the forward pass

    # output_attentions = True path (context + probs)
    ctx, probs = relational_bert_self_attention(
        hidden, mask, dep_rel, qkv_params, NH, output_attentions=True)
    jax.block_until_ready((ctx, probs))

    ctx_ref, probs_ref = reference(hidden, mask, dep_rel, params, NH)
    assert jnp.allclose(ctx, ctx_ref, atol=1e-4, rtol=1e-4), "context mismatch"
    assert jnp.allclose(probs, probs_ref, atol=3e-5, rtol=1e-4), "probs mismatch"

    # output_attentions = False path (context only, no probs writeback)
    (ctx2,) = relational_bert_self_attention(
        hidden, mask, dep_rel, qkv_params, NH, output_attentions=False)
    jax.block_until_ready(ctx2)
    assert jnp.allclose(ctx2, ctx_ref, atol=1e-4, rtol=1e-4), "context mismatch (no probs)"

    print("KERNEL_OK")
</pallas_src>

<mosaic_0001>
module attributes {stable_mosaic.version = 11 : i64} {
  func.func @_qkv_proj_kernel(%arg0: i32, %arg1: i32, %arg2: i32, %arg3: i32, %arg4: memref<16x32xf32, #tpu.memory_space<vmem>>, %arg5: memref<1x32x32xf32, #tpu.memory_space<vmem>>, %arg6: memref<1x1x32xf32, #tpu.memory_space<vmem>>, %arg7: memref<1x16x32xf32, #tpu.memory_space<vmem>>, %arg8: memref<16x32xf32, #tpu.memory_space<vmem>>) attributes {dimension_semantics = [#tpu.dimension_semantics<parallel>, #tpu.dimension_semantics<parallel>, #tpu.dimension_semantics<parallel>, #tpu.dimension_semantics<arbitrary>], iteration_bounds = array<i64: 3, 1, 1, 1>, scalar_prefetch = 0 : i64, scratch_operands = 1 : i64, tpu.core_type = #tpu.core_type<tc>, window_params = [{transform_indices = @transform_0, window_bounds = array<i64: 16, 32>}, {transform_indices = @transform_1, window_bounds = array<i64: 1, 32, 32>}, {transform_indices = @transform_2, window_bounds = array<i64: 1, 1, 32>}, {transform_indices = @transform_3, window_bounds = array<i64: 1, 16, 32>}]} {
    %c0_i32 = arith.constant 0 : i32
    %0 = arith.cmpi eq, %arg3, %c0_i32 : i32
    %1 = arith.extui %0 : i1 to i32
    %c0_i32_0 = arith.constant 0 : i32
    %2 = arith.cmpi ne, %1, %c0_i32_0 : i32
    scf.if %2 {
      %cst_11 = arith.constant 0.000000e+00 : f32
      %13 = vector.broadcast %cst_11 : f32 to vector<16x32xf32>
      %c0_12 = arith.constant 0 : index
      %c0_13 = arith.constant 0 : index
      %14 = vector.load %arg8[%c0_12, %c0_13] : memref<16x32xf32, #tpu.memory_space<vmem>>, vector<16x32xf32>
      tpu.vector_store %arg8[%c0_12, %c0_13], %13 {strides = array<i32>} : memref<16x32xf32, #tpu.memory_space<vmem>>, vector<16x32xf32>,
    } else {
    }
    %c0 = arith.constant 0 : index
    %c0_1 = arith.constant 0 : index
    %3 = vector.load %arg8[%c0, %c0_1] : memref<16x32xf32, #tpu.memory_space<vmem>>, vector<16x32xf32>
    %c0_2 = arith.constant 0 : index
    %c0_3 = arith.constant 0 : index
    %4 = vector.load %arg4[%c0_2, %c0_3] : memref<16x32xf32, #tpu.memory_space<vmem>>, vector<16x32xf32>
    %c0_4 = arith.constant 0 : index
    %c0_5 = arith.constant 0 : index
    %c0_6 = arith.constant 0 : index
    %5 = vector.load %arg5[%c0_4, %c0_5, %c0_6] : memref<1x32x32xf32, #tpu.memory_space<vmem>>, vector<1x32x32xf32>
    %6 = vector.shape_cast %5 : vector<1x32x32xf32> to vector<32x32xf32>
    %cst = arith.constant dense<0.000000e+00> : vector<16x32xf32>
    %7 = tpu.matmul %4, %6, %cst {dimension_numbers = #tpu.dot_dimension_numbers<[1], [0], [0], [1], [0, 0, 1, 1], [], []>} : vector<16x32xf32>, vector<32x32xf32>, vector<16x32xf32> -> vector<16x32xf32>
    %8 = arith.addf %3, %7 : vector<16x32xf32>
    %c0_7 = arith.constant 0 : index
    %c0_8 = arith.constant 0 : index
    %9 = vector.load %arg8[%c0_7, %c0_8] : memref<16x32xf32, #tpu.memory_space<vmem>>, vector<16x32xf32>
    tpu.vector_store %arg8[%c0_7, %c0_8], %8 {strides = array<i32>} : memref<16x32xf32, #tpu.memory_space<vmem>>, vector<16x32xf32>,
    %c0_i32_9 = arith.constant 0 : i32
    %10 = arith.cmpi eq, %arg3, %c0_i32_9 : i32
    %11 = arith.extui %10 : i1 to i32
    %c0_i32_10 = arith.constant 0 : i32
    %12 = arith.cmpi ne, %11, %c0_i32_10 : i32
    scf.if %12 {
      %c0_11 = arith.constant 0 : index
      %c0_12 = arith.constant 0 : index
      %13 = vector.load %arg8[%c0_11, %c0_12] : memref<16x32xf32, #tpu.memory_space<vmem>>, vector<16x32xf32>
      %c0_13 = arith.constant 0 : index
      %c0_14 = arith.constant 0 : index
      %c0_15 = arith.constant 0 : index
      %14 = vector.load %arg6[%c0_13, %c0_14, %c0_15] : memref<1x1x32xf32, #tpu.memory_space<vmem>>, vector<1x1x32xf32>
      %15 = vector.shape_cast %14 : vector<1x1x32xf32> to vector<1x32xf32>
      %16 = vector.broadcast %15 : vector<1x32xf32> to vector<16x32xf32>
      %17 = arith.addf %13, %16 : vector<16x32xf32>
      %c0_16 = arith.constant 0 : index
      %c0_17 = arith.constant 0 : index
      %c0_18 = arith.constant 0 : index
      %18 = vector.load %arg7[%c0_16, %c0_17, %c0_18] : memref<1x16x32xf32, #tpu.memory_space<vmem>>, vector<1x16x32xf32>
      %19 = vector.shape_cast %18 : vector<1x16x32xf32> to vector<16x32xf32>
      %20 = vector.shape_cast %17 : vector<16x32xf32> to vector<1x16x32xf32>
      tpu.vector_store %arg7[%c0_16, %c0_17, %c0_18], %20 {strides = array<i32>} : memref<1x16x32xf32, #tpu.memory_space<vmem>>, vector<1x16x32xf32>,
    } else {
    }
    return
  }
  func.func @transform_0(%arg0: i32, %arg1: i32, %arg2: i32, %arg3: i32) -> (i32, i32) {
    %c0_i32 = arith.constant 0 : i32
    return %arg1, %arg3 : i32, i32
  }
  func.func @transform_1(%arg0: i32, %arg1: i32, %arg2: i32, %arg3: i32) -> (i32, i32, i32) {
    %c0_i32 = arith.constant 0 : i32
    return %arg0, %arg3, %arg2 : i32, i32, i32
  }
  func.func @transform_2(%arg0: i32, %arg1: i32, %arg2: i32, %arg3: i32) -> (i32, i32, i32) {
    %c0_i32 = arith.constant 0 : i32
    %c0_i32_0 = arith.constant 0 : i32
    return %arg0, %c0_i32, %arg2 : i32, i32, i32
  }
  func.func @transform_3(%arg0: i32, %arg1: i32, %arg2: i32, %arg3: i32) -> (i32, i32, i32) {
    %c0_i32 = arith.constant 0 : i32
    return %arg0, %arg1, %arg2 : i32, i32, i32
  }
}

</mosaic_0001>

<bundles_post_ra>
// kernel: tpu_custom_call.1
= control target key start
LH: loop header
LB: loop body
LE: loop exit
PB: predicated region body
PF: predicated region fallthrough
CT: control target
= control target key end

     0   :  { %8 = vsyncpa [#allocation4], 0  ;;  %s1073_s0 = inlined_call_operand.hbm [shape: f32[16,32], index: 0, kind: input, shape index: {}]   ;;  %s1074_s1 = inlined_call_operand.hbm [shape: f32[3,32,32], index: 1, kind: input, shape index: {}]   ;;  %s1075_s2 = inlined_call_operand.vmem [shape: f32[3,1,32], index: 2, kind: input, shape index: {}]   ;;  %s1076_s3 = inlined_call_operand.hbm [shape: f32[3,16,32], index: 3, kind: output, shape index: {}]  }
   0x1   :  { %9 = vsyncpa [#allocation7], 0 }
   0x2   :  { %11 = vsyncpa [#allocation7 + $0x1], 0 }
   0x3   :  { %12 = vsyncpa [#allocation5], 0 }
   0x4   :  { %14 = vsyncpa [#allocation5 + $0x1], 0  ;;  %s836_s12 = smov 0   ;;  %s838_s13 = smov 0  }
   0x5   :  { %s840_s14 = smov 0   ;;  %s842_s15 = smov 0  }
   0x6   :  { %s844_s16 = smov 0   ;;  %s846_s17 = smov 0  }
   0x7 LB: > { %s537_s18 = sadd.s32 4294967295, %s806_s17   ;;  %s538_s19 = sadd.s32 4294967294, %s806_s17   ;;  %s806_s17 = sphi %s846_s17, %s20_s17   ;;  %s802_s16 = sphi %s844_s16, %s1099_s16   ;;  %s798_s15 = sphi %s842_s15, %s1098_s15   ;;  %s794_s14 = sphi %s840_s14, %s1097_s14   ;;  %s790_s13 = sphi %s838_s13, %s1096_s13   ;;  %s786_s12 = sphi %s836_s12, %s1095_s12  }
   0x8   : > { %p98_p0 = scmp.ne.s32.totalorder %s790_s13, %s786_s12  ;;  %p870_p1 = scmp.eq.s32.totalorder %s537_s18, 0 }
   0x9   : > { %p874_p2 = scmp.eq.s32.totalorder %s537_s18, 2  ;;  %p160_p3 = scmp.eq.s32.totalorder %s538_s19, 2 }
   0xa   : > { %s1081_s20 = scalar_select %p870_p1, 1, 0 }
   0xb   : > { %s1082_s21 = scalar_select %p874_p2, 1, 0 }
   0xc   : > { %p880_p4 = por %p870_p1, %p98_p0  ;;  %p539_p5 = scmp.ge.s32.totalorder %s806_s17, 1 }
   0xd   : > { %p885_p6 = por %p160_p3, %p98_p0  ;;  %p167_p7 = scmp.lt.s32.totalorder %s806_s17, 4 }
   0xe   : > { %s1083_s22 = scalar_select %p880_p4, 1, 0 }
   0xf   : > { %s1084_s23 = scalar_select %p885_p6, 1, 0 }
  0x10   : > { %p890_p8 = pnand %p539_p5, %p167_p7  ;;  %s808_s25 = smov [#allocation3]  }
  0x11   : > { %s183_s26 = sshll.u32 %s808_s25, 4  ;;  %s46_s28 = sadd.s32 1, %s802_s16  ;;  %s184_s26 = int_to_ptr.vmem [resolvable:$true] %s183_s26 }
  0x12   : > { %s1085_s24 = scalar_select %p890_p8, 1, 0 }
  0x13   : > { %p592_p9 = pneg %p890_p8  ;;  %s662_s4 = scalar_lea.hbm %s1073_s0, 256 }
  0x14   : > { %p663_p11 = scmp.ne.s32.totalorder %s1073_s0, %s662_s4  ;;  %p669_p3 = scmp.lt.u32.totalorder %s662_s4, %s1073_s0 }
  0x15   : > { %p898_p10 = pnand %p592_p9, %p870_p1 }
  0x17   : > { %p664_p12 = pneg %p898_p10 }
  0x19   : > { %p665_p13 = pnand %p664_p12, %p663_p11 }
  0x1b   : > { %p666_p0 = pneg %p665_p13 }
  0x1d   : > { %p671_p5 = pnand %p669_p3, %p666_p0 }
  0x1f   : > { %674 = shalt.err (!%p671_p5)
}
  0x20   : > { %s675_s9 = scalar_lea.vmem %s184_s26, 256  ;;  %p683_p4 = scmp.lt.s32.totalorder %s184_s26, %s184_s26 }
  0x21   : > { %p676_p7 = scmp.ne.s32.totalorder %s184_s26, %s675_s9  ;;  %p684_p1 = scmp.lt.s32.totalorder %s675_s9, %s675_s9 }
  0x23   : > { %p678_p9 = pnand %p676_p7, %p664_p12  ;;  %p685_p8 = por %p684_p1, %p683_p4 }
  0x25   : > { %p679_p6 = pneg %p678_p9 }
  0x27   : > { %p686_p2 = pnand %p685_p8, %p679_p6 }
  0x29   : > { %689 = shalt.err (!%p686_p2)
}
  0x2a   : > { %s809_s10 = smov 128   ;;  %s810_s11 = smov 8  }
  0x2b   : > { %595 = dma.hbm_to_vmem [thread:$0]  (!%p898_p10), %s1073_s0, 256, %s184_s26, [#allocation4], %s809_s10, %s809_s10, %s810_s11  }
  0x2c   : > { %p48_p1 = scmp.ge.s32.totalorder %s46_s28, 3  ;;  %s85_s25 = sadd.s32 1, %s794_s14 }
  0x2d   : > { %p92_p2 = scmp.ne.s32.totalorder %s794_s14, %s790_s13  ;;  %p93_p4 = scmp.eq.s32.totalorder %s806_s17, 0 }
  0x2e   : > { %s1101_s28 = smov (%p48_p1, %s46_s28), 0  ;;  %p1088_p8 = scmp.ne.s32.totalorder %s1082_s21, 0 }
  0x2f   : > { %p928_p6 = por %p93_p4, %p92_p2  ;;  %s78_s30 = ssub.s32 %s802_s16, %s1101_s28 }
  0x30   : > { %p934_p11 = por %p1088_p8, %p92_p2  ;;  %p605_p12 = scmp.lt.s32.totalorder %s806_s17, 3 }
  0x31   : > { %p83_p10 = scmp.eq.s32.totalorder %s78_s30, 0  ;;  %s197_s26 = sand.u32 1, %s794_s14  }
  0x32   : > { %s542_s4 = sshll.u32 %s197_s26, 5  ;;  %s557_s6 = sshll.u32 %s802_s16, 9 }
  0x33   : > { %s943_s5 = scalar_select %p83_p10, %s794_s14, %s85_s25  }
  0x34   : > { %s949_s9 = scalar_lea.hbm %s1074_s1, %s557_s6  ;;  %s201_s21 = scalar_lea.vmem [#allocation6], %s542_s4 }
  0x35   : > { %s211_s18 = sshll.u32 %s201_s21, 4  ;;  %p955_p13 = pnand %p605_p12, %p928_p6  ;;  %s951_s18 = int_to_ptr.vmem [resolvable:$true] %s211_s18 }
  0x36   : > { %s959_s25 = scalar_lea.sflag [#allocation7], %s197_s26  ;;  %s690_s30 = scalar_lea.hbm %s949_s9, 512 }
  0x37   : > { %p691_p0 = scmp.ne.s32.totalorder %s949_s9, %s690_s30  ;;  %p692_p3 = pneg %p955_p13 }
  0x38   : > { %s695_s29 = scalar_lea.hbm %s1074_s1, 1536  ;;  %p696_p9 = scmp.lt.u32.totalorder %s949_s9, %s1074_s1 }
  0x39   : > { %p693_p5 = pnand %p692_p3, %p691_p0  ;;  %p697_p1 = scmp.lt.u32.totalorder %s695_s29, %s690_s30 }
  0x3a   : > { %p699_p4 = scmp.lt.u32.totalorder %s690_s30, %s949_s9 }
  0x3b   : > { %p694_p7 = pneg %p693_p5  ;;  %p698_p2 = por %p697_p1, %p696_p9 }
  0x3d   : > { %p700_p6 = por %p699_p4, %p698_p2 }
  0x3f   : > { %p701_p8 = pnand %p700_p6, %p694_p7 }
  0x41   : > { %704 = shalt.err (!%p701_p8)
}
  0x42   : > { %s705_s26 = scalar_lea.vmem %s951_s18, 512  ;;  %s811_s21 = smov [#allocation6]  }
  0x43   : > { %p706_p12 = scmp.ne.s32.totalorder %s951_s18, %s705_s26  ;;  %s710_s4 = sshll.u32 %s811_s21, 4  ;;  %s711_s4 = int_to_ptr.vmem [resolvable:$false] %s710_s4 }
  0x44   : > { %s712_s6 = scalar_lea.vmem %s711_s4, 1024  ;;  %p713_p5 = scmp.lt.s32.totalorder %s951_s18, %s711_s4 }
  0x45   : > { %p708_p10 = pnand %p706_p12, %p692_p3  ;;  %p714_p9 = scmp.lt.s32.totalorder %s712_s6, %s705_s26 }
  0x47   : > { %p709_p0 = pneg %p708_p10  ;;  %p715_p1 = por %p714_p9, %p713_p5 }
  0x49   : > { %p716_p2 = pnand %p715_p1, %p709_p0 }
  0x4b   : > { %719 = shalt.err (!%p716_p2)
}
  0x4c   : > { %599 = dma.hbm_to_vmem [thread:$0]  (!%p955_p13), %s949_s9, 512, %s951_s18, %s959_s25, %s809_s10, %s809_s10, %s810_s11  }
  0x4d   : > { %p1091_p3 = scmp.ne.s32.totalorder %s1085_s24, 0 }
  0x4e   : > { %p1092_p7 = scmp.ne.s32.totalorder (!%p1091_p3), %s1081_s20, 0 }
  0x4f   : > { %232 = sbr.rel (%p1091_p3) target bundleno = 342 (0x156), region = 32 }
  0x56   : > { %773 = dma.done.wait (%p1092_p7), [#allocation4], 256  }
  0x57   : > { %775 = vsyncadd (%p1092_p7), [#allocation4], 4294967040  ;;  %s997_s30 = sand.u32 1, %s790_s13   ;;  %p1093_p4 = scmp.ne.s32.totalorder %s1083_s22, 0 }
  0x58   : > { %s547_s19 = sshll.u32 %s997_s30, 5  ;;  %s239_s29 = scalar_lea.sflag [#allocation7], %s997_s30 }
  0x59   : > { %s242_s7 = scalar_lea.vmem [#allocation6], %s547_s19 }
  0x5a   : > { %777 = dma.done.wait (%p1093_p4), %s239_s29, 512  }
  0x5b   : > { %779 = vsyncadd (%p1093_p4), %s239_s29, 4294966784  ;;  %vm284_vm0 = vcmask 261120   ;;  %v812_v0 = vmov 0.0   ;;  %v291_v1 = vld [vmem:[%s242_s7] sm:$0xff]  ;;  %v292_v2 = vld [vmem:[%s242_s7 + $0x8] sm:$0xff]  ;;  %p273_p13 = scmp.lt.s32.totalorder %s798_s15, 2 }
  0x5c   : > { %286 = vst.msk [vmem:[#allocation2 + $0x8] sm:$0xff] %vm284_vm0, %v812_v0  ;;  %285 = vst.msk [vmem:[#allocation2] sm:$0xff] %vm284_vm0, %v812_v0  ;;  %v293_v3 = vld [vmem:[%s242_s7 + $0x10] sm:$0xff]  ;;  %v576_v4 = vpack.c.bf16 %v292_v2, %v291_v1  ;;  %v294_v5 = vld [vmem:[%s242_s7 + $0x18] sm:$0xff]  ;;  %s548_s22 = sshll.u32 %s997_s30, 4  ;;  %s558_s9 = sshll.u32 %s798_s15, 8 }
  0x5d   : > { %v289_v6 = vld [vmem:[#allocation3] sm:$0xff]  ;;  %v580_v7 = vpack.c.bf16 %v294_v5, %v293_v3  ;;  %v290_v8 = vld [vmem:[#allocation3 + $0x8] sm:$0xff]  ;;  %s274_s20 = scalar_select %p273_p13, %s798_s15, 2 }
  0x5e   : > { %573 = vmatprep.mubr.msk.f32.mxu0 %vm284_vm0, %v289_v6  ;;  %577 = vmatprep.subr.bf16.mxu0 %v576_v4  ;;  %s270_s18 = scalar_lea.vmem [#allocation8], %s548_s22  ;;  %s1021_s21 = scalar_lea.hbm %s1076_s3, %s558_s9 }
  0x5f   : > { %579 = vmatpush3.bf16.msra.mxu0 %v576_v4  ;;  %s278_s11 = scalar_lea.vmem %s1075_s2, %s274_s20  ;;  %s414_s25 = sshll.u32 %s270_s18, 4  ;;  %s1023_s25 = int_to_ptr.vmem [resolvable:$true] %s414_s25 }
  0x60   : > { %581 = vmatprep.subr.bf16.mxu0 %v580_v7  ;;  %v551_v15 = vld [vmem:[%s278_s11] ss:$0 sm:$0xff]  ;;  %s398_s15 = scalar_lea.sflag [#allocation5], %s997_s30  ;;  %s720_s4 = scalar_lea.vmem %s1023_s25, 256 }
  0x61   : > { %p721_p6 = scmp.ne.s32.totalorder %s1023_s25, %s720_s4  ;;  %s813_s6 = smov [#allocation8]  }
  0x62   : > { %s724_s19 = sshll.u32 %s813_s6, 4  ;;  %s725_s19 = int_to_ptr.vmem [resolvable:$false] %s724_s19 }
  0x63   : > { %583 = vmatpush3.bf16.msra.mxu0 %v580_v7  ;;  %v288_v9 = vld [vmem:[#allocation2 + $0x8] sm:$0xff]  ;;  %v287_v10 = vld [vmem:[#allocation2] sm:$0xff]  ;;  %p722_p8 = pnand %p721_p6, %p934_p11  ;;  %s726_s29 = scalar_lea.vmem %s725_s19, 512 }
  0x64   : > { %p727_p10 = scmp.lt.s32.totalorder %s1023_s25, %s725_s19  ;;  %p728_p0 = scmp.lt.s32.totalorder %s726_s29, %s720_s4 }
  0x65   : > { %p723_p12 = pneg %p722_p8 }
  0x66   : > { %574 = vmatmul.mubr.msk.f32.vlgmr.msra.gmra.mrb[0].mxu0 %vm284_vm0, %v290_v8  ;;  %p729_p5 = por %p728_p0, %p727_p10 }
  0x68   : > { %p730_p9 = pnand %p729_p5, %p723_p12 }
 0x139   : > { %v575_v11 = vpop.f32.mrb[0].mxu0 }
 0x13a   : > { %v378_v12 = vadd.f32 %v575_v11, %v288_v9  ;;  %v368_v13 = vpop.f32.mrb[1].mxu0 }
 0x13b   : > { %v377_v14 = vadd.f32 %v368_v13, %v287_v10 }
 0x13c   : > { %380 = vst.msk [vmem:[#allocation2 + $0x8] sm:$0xff] %vm284_vm0, %v378_v12 }
 0x13d   : > { %379 = vst.msk [vmem:[#allocation2] sm:$0xff] %vm284_vm0, %v377_v14 }
 0x143   : > { %v385_v16 = vld [vmem:[#allocation2 + $0x8] sm:$0xff] }
 0x144   : > { %v384_v17 = vld [vmem:[#allocation2] sm:$0xff]  ;;  %v394_v18 = vadd.f32 %v551_v15, %v385_v16 }
 0x145   : > { %v393_v19 = vadd.f32 %v551_v15, %v384_v17 }
 0x146   : > { %396 = vst.msk [vmem:[%s270_s18 + $0x8] sm:$0xff] %vm284_vm0, %v394_v18 }
 0x147   : > { %395 = vst.msk [vmem:[%s270_s18] sm:$0xff] %vm284_vm0, %v393_v19 }
 0x148   : > { %733 = shalt.err (!%p730_p9)
}
 0x149   : > { %s734_s7 = scalar_lea.hbm %s1021_s21, 256  ;;  %s738_s24 = scalar_lea.hbm %s1076_s3, 768 }
 0x14a   : > { %p735_p1 = scmp.ne.s32.totalorder %s1021_s21, %s734_s7  ;;  %p739_p7 = scmp.lt.u32.totalorder %s1021_s21, %s1076_s3 }
 0x14b   : > { %p740_p4 = scmp.lt.u32.totalorder %s738_s24, %s734_s7  ;;  %p742_p6 = scmp.lt.u32.totalorder %s734_s7, %s1021_s21 }
 0x14c   : > { %p736_p2 = pnand %p735_p1, %p934_p11 }
 0x14d   : > { %p741_p13 = por %p740_p4, %p739_p7 }
 0x14e   : > { %p737_p3 = pneg %p736_p2 }
 0x14f   : > { %p743_p8 = por %p742_p6, %p741_p13 }
 0x151   : > { %p744_p12 = pnand %p743_p8, %p737_p3 }
 0x153   : > { %747 = shalt.err (!%p744_p12)
}
 0x154   : > { %s814_s9 = smov 128   ;;  %s815_s18 = smov 8  }
 0x155   : > { %590 = dma.vmem_to_hbm [thread:$0]  (%p934_p11), %s1023_s25, 256, %s1021_s21, %s398_s15, %s814_s9, %s814_s9, %s815_s18  }
 0x156 PF: > { %p607_p10 = scmp.ge.s32.totalorder %s806_s17, 2  ;;  %s429_s8 = sand.u32 1, %s786_s12  }
 0x157   : > { %p1094_p0 = scmp.ne.s32.totalorder %s1084_s23, 0  ;;  %s430_s26 = scalar_lea.sflag [#allocation5], %s429_s8 }
 0x159   : > { %p601_p5 = pnand %p607_p10, %p1094_p0 }
 0x15b   : > { %781 = dma.done.wait (!%p601_p5), %s430_s26, 256  }
 0x15c   : > { %783 = vsyncadd (!%p601_p5), %s430_s26, 4294967040  ;;  %s20_s17 = sadd.s32 1, %s806_s17   ;;  %s1095_s12 = smov %s790_s13 }
 0x15d   : > { %p17_p9 = scmp.ge.s32.totalorder %s20_s17, 5   ;;  %s1096_s13 = smov %s794_s14 }
 0x15e   : > { %s1097_s14 = smov %s943_s5  ;;  %s1098_s15 = smov %s802_s16 }
 0x15f   : > { %s1099_s16 = smov %s1101_s28  ;;  %19 = sbr.rel (!%p17_p9) target bundleno = 7 (0x7), region = 94 }
 0x166   :  { %435 = vsyncpa [#allocation4], 1 }
 0x167   :  { %437 = vsyncpa [#allocation4 + $0x1], 1 }
 0x168   :  { %438 = vsyncpa [#allocation7], 1 }
 0x169   :  { %440 = vsyncpa [#allocation7 + $0x1], 1 }
 0x16a   :  { %441 = vsyncpa [#allocation5], 1 }
 0x16b   :  { %443 = vsyncpa [#allocation5 + $0x1], 1 }

</bundles_post_ra>
